<compile_context>
chip_gen: v6e
topology: v6e:2x2x1
jax: 0.10.0
libtpu: 0.0.40
codegen_flags: <defaults>
</compile_context>

<pallas_src>
import jax
import jax.numpy as jnp
from jax.experimental import pallas as pl
from jax.experimental.pallas import tpu as pltpu


def critic_forward(state, w1, b1, w2, b2, *, tb=None):
    """state: [B, S]; w1: [S, H]; b1: [1, H]; w2: [H, 1]; b2: [1, 1]."""
    B, S = state.shape
    H = w1.shape[1]
    assert w1.shape == (S, H)
    assert b1.shape == (1, H)
    assert w2.shape == (H, 1)
    assert b2.shape == (1, 1)

    # --- pack parameters into a single [S+3, H] slab -----------------------
    # rows 0..S-1 : W1
    # row  S      : b1
    # row  S+1    : w2ᵀ
    # row  S+2    : b2 in column 0 (rest zero padding)
    b2_row = jnp.zeros((1, H), state.dtype).at[0, 0].set(b2[0, 0])
    params = jnp.concatenate(
        [w1.astype(state.dtype), b1.astype(state.dtype),
         w2.T.astype(state.dtype), b2_row], axis=0)  # [S+3, H]

    # --- batch tiling -------------------------------------------------------
    if tb is None:
        tb = 8 if B <= 128 else 128           # multiple of 8 (f32 sublane tile)
    n_blocks = pl.cdiv(B, tb)
    Bp = n_blocks * tb
    x = state if Bp == B else jnp.pad(state, ((0, Bp - B), (0, 0)))

    def kernel(x_ref, p_ref, o_ref):
        p = p_ref[...]                         # whole slab: one small VMEM load
        w1_ = p[0:S, :]                        # [S, H]
        b1_ = p[S:S + 1, :]                    # [1, H]
        w2t = p[S + 1:S + 2, :]                # [1, H]
        b2_ = p[S + 2:S + 3, 0:1]              # [1, 1]
        # fc1 on the MXU, f32 accumulate
        h = jnp.dot(x_ref[...], w1_, preferred_element_type=jnp.float32)
        h = jnp.maximum(h + b1_, 0.0)          # bias + ReLU on the VPU
        # fc2 (N=1) as an elementwise mul + lane reduction (VPU/XLU, no MXU)
        v = jnp.sum(h * w2t, axis=-1, keepdims=True) + b2_
        o_ref[...] = v.astype(o_ref.dtype)

    out = pl.pallas_call(
        kernel,
        out_shape=jax.ShapeDtypeStruct((Bp, 1), state.dtype),
        grid=(n_blocks,),
        in_specs=[
            pl.BlockSpec((tb, S), lambda i: (i, 0)),       # batch tile of x
            pl.BlockSpec((S + 3, H), lambda i: (0, 0)),    # resident param slab
        ],
        out_specs=pl.BlockSpec((tb, 1), lambda i: (i, 0)),
        compiler_params=pltpu.CompilerParams(
            dimension_semantics=("parallel",)),
    )(x, params)
    return out[:B]


def init_params(key, state_dim, hidden_dim):
    # Deterministic init mimicking torch.nn.Linear default U[-1/sqrt(in), 1/sqrt(in)].
    k1, k2, k3, k4 = jax.random.split(key, 4)
    bound1 = 1.0 / jnp.sqrt(state_dim)
    bound2 = 1.0 / jnp.sqrt(hidden_dim)
    w1 = jax.random.uniform(k1, (state_dim, hidden_dim), jnp.float32, -bound1, bound1)
    b1 = jax.random.uniform(k2, (1, hidden_dim), jnp.float32, -bound1, bound1)
    w2 = jax.random.uniform(k3, (hidden_dim, 1), jnp.float32, -bound2, bound2)
    b2 = jax.random.uniform(k4, (1, 1), jnp.float32, -bound2, bound2)
    return w1, b1, w2, b2


if __name__ == "__main__":
    state_dim, hidden_dim, action_dim = 4, 32, 2  # action_dim unused by CriticNet
    batch = 8

    key = jax.random.PRNGKey(0)
    kx, kp = jax.random.split(key)
    state = jax.random.normal(kx, (batch, state_dim), jnp.float32)
    w1, b1, w2, b2 = init_params(kp, state_dim, hidden_dim)

    value = critic_forward(state, w1, b1, w2, b2)
    value = jax.block_until_ready(value)

    # Reference check in plain JAX
    ref = jnp.maximum(state @ w1 + b1, 0.0) @ w2 + b2
    assert value.shape == (batch, 1)
    assert jnp.allclose(value, ref, atol=1e-5, rtol=1e-5)

    print("KERNEL_OK")
</pallas_src>

<mosaic_0001>
module attributes {stable_mosaic.version = 11 : i64} {
  func.func @kernel(%arg0: i32, %arg1: memref<8x4xf32, #tpu.memory_space<vmem>>, %arg2: memref<7x32xf32, #tpu.memory_space<vmem>>, %arg3: memref<8x1xf32, #tpu.memory_space<vmem>>) attributes {dimension_semantics = [#tpu.dimension_semantics<parallel>], iteration_bounds = array<i64: 1>, scalar_prefetch = 0 : i64, scratch_operands = 0 : i64, tpu.core_type = #tpu.core_type<tc>, window_params = [{transform_indices = @transform_0, window_bounds = array<i64: 8, 4>}, {pipeline_mode = #tpu.pipeline_mode<synchronous>, transform_indices = @transform_1, window_bounds = array<i64: 7, 32>}, {transform_indices = @transform_2, window_bounds = array<i64: 8, 1>}]} {
    %c0 = arith.constant 0 : index
    %c0_0 = arith.constant 0 : index
    %0 = vector.load %arg2[%c0, %c0_0] : memref<7x32xf32, #tpu.memory_space<vmem>>, vector<7x32xf32>
    %1 = vector.extract_strided_slice %0 {offsets = [0, 0], sizes = [4, 32], strides = [1, 1]} : vector<7x32xf32> to vector<4x32xf32>
    %2 = vector.extract_strided_slice %0 {offsets = [4, 0], sizes = [1, 32], strides = [1, 1]} : vector<7x32xf32> to vector<1x32xf32>
    %3 = vector.extract_strided_slice %0 {offsets = [5, 0], sizes = [1, 32], strides = [1, 1]} : vector<7x32xf32> to vector<1x32xf32>
    %4 = vector.extract_strided_slice %0 {offsets = [6, 0], sizes = [1, 1], strides = [1, 1]} : vector<7x32xf32> to vector<1x1xf32>
    %c0_1 = arith.constant 0 : index
    %c0_2 = arith.constant 0 : index
    %5 = vector.load %arg1[%c0_1, %c0_2] : memref<8x4xf32, #tpu.memory_space<vmem>>, vector<8x4xf32>
    %cst = arith.constant dense<0.000000e+00> : vector<8x32xf32>
    %6 = tpu.matmul %5, %1, %cst {dimension_numbers = #tpu.dot_dimension_numbers<[1], [0], [0], [1], [0, 0, 1, 1], [], []>} : vector<8x4xf32>, vector<4x32xf32>, vector<8x32xf32> -> vector<8x32xf32>
    %7 = vector.broadcast %2 : vector<1x32xf32> to vector<8x32xf32>
    %8 = arith.addf %6, %7 : vector<8x32xf32>
    %cst_3 = arith.constant 0.000000e+00 : f32
    %9 = vector.broadcast %cst_3 : f32 to vector<8x32xf32>
    %10 = arith.maximumf %8, %9 : vector<8x32xf32>
    %11 = vector.broadcast %3 : vector<1x32xf32> to vector<8x32xf32>
    %12 = arith.mulf %10, %11 : vector<8x32xf32>
    %cst_4 = arith.constant dense<0.000000e+00> : vector<8xf32>
    %13 = vector.multi_reduction <add>, %12, %cst_4 [1] : vector<8x32xf32> to vector<8xf32>
    %14 = vector.shape_cast %13 : vector<8xf32> to vector<8x1xf32>
    %15 = vector.broadcast %4 : vector<1x1xf32> to vector<8x1xf32>
    %16 = arith.addf %14, %15 : vector<8x1xf32>
    %c0_5 = arith.constant 0 : index
    %c0_6 = arith.constant 0 : index
    %17 = vector.load %arg3[%c0_5, %c0_6] : memref<8x1xf32, #tpu.memory_space<vmem>>, vector<8x1xf32>
    tpu.vector_store %arg3[%c0_5, %c0_6], %16 {strides = array<i32>} : memref<8x1xf32, #tpu.memory_space<vmem>>, vector<8x1xf32>,
    return
  }
  func.func @transform_0(%arg0: i32) -> (i32, i32) {
    %c0_i32 = arith.constant 0 : i32
    %c0_i32_0 = arith.constant 0 : i32
    return %arg0, %c0_i32 : i32, i32
  }
  func.func @transform_1(%arg0: i32) -> (i32, i32) {
    %c0_i32 = arith.constant 0 : i32
    %c0_i32_0 = arith.constant 0 : i32
    %c0_i32_1 = arith.constant 0 : i32
    return %c0_i32, %c0_i32_0 : i32, i32
  }
  func.func @transform_2(%arg0: i32) -> (i32, i32) {
    %c0_i32 = arith.constant 0 : i32
    %c0_i32_0 = arith.constant 0 : i32
    return %arg0, %c0_i32 : i32, i32
  }
}

</mosaic_0001>

<bundles_post_ra>
// kernel: tpu_custom_call.1
= control target key start
LH: loop header
LB: loop body
LE: loop exit
PB: predicated region body
PF: predicated region fallthrough
CT: control target
= control target key end

     0   :  { %vm21_vm0 = vcmask 1043456   ;;  %vm17_vm1 = vcmask 31744   ;;  %v127_v0 = vmov 0.0   ;;  %vm128_vm2 = vmmov 0   ;;  %s153_s1 = inlined_call_operand.vmem [shape: f32[7,32], index: 1, kind: input, shape index: {}]   ;;  %s154_s0 = inlined_call_operand.vmem [shape: f32[8,4], index: 0, kind: input, shape index: {}]   ;;  %s155_s2 = inlined_call_operand.vmem [shape: f32[8,1], index: 2, kind: output, shape index: {}]  }
   0x1   :  { %120 = vmatprep.subr.mxu0 %v127_v0  ;;  %v11_v1 = vld [vmem:[%s153_s1] sm:$0x7f]  ;;  %122 = vmatprep.mubr.msk.f32.mxu0 %vm128_vm2, %v127_v0  ;;  %v13_v3 = vlaneseq  ;;  %vm101_vm3 = vcmask 261120   ;;  %vm110_vm4 = vcmask 7168  }
   0x2   :  { %v12_v2 = vld [vmem:[%s154_s0] sm:$0xff]  ;;  %121 = vmatpush3.msk.msra.mxu0 %vm21_vm0, %v11_v1 }
   0x3   :  { %123 = vmatmul.mubr.msk.f32.vlgmr.msra.gmra.mxu0 %vm17_vm1, %v12_v2  ;;  %v14_v4 = vshrl.u32 %v13_v3, 7 }
   0x5   :  { %v15_v5 = vsub.s32 4, %v14_v4  ;;  %v98_v7 = vsub.s32 5, %v14_v4  ;;  %v107_v15 = vsub.s32 6, %v14_v4 }
   0x7   :  { %v16_v6 = vrot.slane %v11_v1, %v15_v5  ;;  %v99_v10 = vrot.slane %v11_v1, %v98_v7  ;;  %v108_v16 = vrot.slane %v11_v1, %v107_v15 }
  0xc3   :  { %v91_v8 = vpop.f32.mrf.mxu0 }
  0xc4   :  { %v92_v9 = vadd.f32 %v91_v8, %v16_v6 }
  0xc5   :  { %v124_v11 = vpop.f32.mrf.mxu0 }
  0xc6   :  { %v95_v12 = vmax.f32 %v92_v9, 0.0 }
  0xc8   :  { %v100_v13 = vmul.f32 %v99_v10, %v95_v12 }
  0xca   :  { %v102_v14 = vsel %vm101_vm3, %v100_v13, 0.0 }
  0xcb   :  { %103 = vadd.xlane.f32.xlu0 %v102_v14 }
 0x154   :  { %v104_v17 = vpop.xlane.xlu0 %103 }
 0x155   :  { %v109_v18 = vadd.f32 %v108_v16, %v104_v17 }
 0x157   :  { %111 = vst.msk [vmem:[%s155_s2] sm:$0xff] %vm110_vm4, %v109_v18 }

</bundles_post_ra>
